<compile_context>
chip_gen: v7x
topology: tpu7x:2x2x1
jax: 0.10.0
libtpu: 0.0.40
codegen_flags: <defaults>
</compile_context>

<pallas_src>
import math

import jax
import jax.numpy as jnp
from jax.experimental import pallas as pl
from jax.experimental.pallas import tpu as pltpu


# ----------------------------- kernels ------------------------------------ #

def _support_kernel(x_ref, w_ref, o_ref):
    # support row-tile = X_tile @ W  (f32 accumulation on the MXU, bf16 output)
    o_ref[...] = jnp.dot(
        x_ref[...], w_ref[...], preferred_element_type=jnp.float32
    ).astype(o_ref.dtype)


def _aggregate_streamed_kernel(adj_ref, s_ref, b_ref, o_ref, acc_ref):
    # support tile streamed per K step: s_ref is (tk, f_out_pad) bf16.
    k = pl.program_id(1)

    @pl.when(k == 0)
    def _():
        acc_ref[...] = jnp.zeros_like(acc_ref)

    # Native bf16 x bf16 MXU matmul, f32 accumulation.
    acc_ref[...] += jnp.dot(adj_ref[...], s_ref[...],
                            preferred_element_type=jnp.float32)

    @pl.when(k == pl.num_programs(1) - 1)
    def _():
        o_ref[...] = jnp.tanh(acc_ref[...] + b_ref[...]).astype(o_ref.dtype)


def _make_aggregate_resident_kernel(tk):
    # Whole bf16 support resident in VMEM (constant index_map -> fetched once);
    # the kernel slices the (tk, f_out_pad) row band itself.
    def kernel(adj_ref, s_ref, b_ref, o_ref, acc_ref):
        k = pl.program_id(1)

        @pl.when(k == 0)
        def _():
            acc_ref[...] = jnp.zeros_like(acc_ref)

        row0 = pl.multiple_of(k * tk, tk)
        s_tile = s_ref[pl.ds(row0, tk), :]
        acc_ref[...] += jnp.dot(adj_ref[...], s_tile,
                                preferred_element_type=jnp.float32)

        @pl.when(k == pl.num_programs(1) - 1)
        def _():
            o_ref[...] = jnp.tanh(acc_ref[...] + b_ref[...]).astype(o_ref.dtype)

    return kernel


# ----------------------------- helpers ------------------------------------ #

def _pick_tile(n, target, align):
    """Largest t <= target that divides n and is a multiple of `align`; else n."""
    t = min(target, n)
    t -= t % align
    while t >= align:
        if n % t == 0:
            return t
        t -= align
    return n  # fall back to full extent (always legal as a BlockSpec dim)


def prepare_adjacency(adj, dtype=jnp.bfloat16):
    """Quantize the (row-normalized) dense adjacency once; reuse across layers/steps."""
    return adj.astype(dtype)


# ----------------------------- wrapper ------------------------------------ #

# Keep the resident bf16 support comfortably inside VMEM on every generation
# (counted x2 conservatively for buffering) -> at most ~16 MiB of VMEM.
_SUPPORT_RESIDENT_BYTES = 8 * 1024 * 1024


def graph_convolution(adj, x, weight, bias, *, tm=1024, tk=1024,
                      adj_stream_dtype=jnp.bfloat16):
    """tanh(adj @ (x @ weight) + bias)  — VGAER GraphConvolution forward.

    `adj` should already be in `adj_stream_dtype` (use prepare_adjacency once);
    otherwise a fallback cast is done here (costs an extra pass over adj).
    """
    N, f_in = x.shape
    f_in_w, f_out = weight.shape
    assert f_in_w == f_in
    assert adj.shape == (N, N)

    # Lane-dense output: pad the feature axis up to a multiple of 128.
    f_out_pad = max(128, ((f_out + 127) // 128) * 128)
    pad_cols = f_out_pad - f_out
    w_p = jnp.pad(weight.astype(jnp.float32), ((0, 0), (0, pad_cols)))
    b_p = jnp.pad(bias.astype(jnp.float32), (0, pad_cols)).reshape(1, f_out_pad)

    # ---- Stage-2 tile selection (divisors of N, hardware-aligned) -------- #
    tm = _pick_tile(N, tm, 8)
    tk = _pick_tile(N, tk, 128)
    # v7x has 2 TensorCores/chip: keep the "parallel" row axis >= 2 steps.
    if N // tm < 2 and N % 2 == 0 and (N // 2) % 8 == 0:
        tm = N // 2

    # ---- Stage 1: support = X @ W in bf16 (computed once) ---------------- #
    tm1 = _pick_tile(N, 4096, 8)
    support = pl.pallas_call(
        _support_kernel,
        out_shape=jax.ShapeDtypeStruct((N, f_out_pad), jnp.bfloat16),
        grid=(N // tm1,),
        in_specs=[
            pl.BlockSpec((tm1, f_in), lambda i: (i, 0)),
            pl.BlockSpec((f_in, f_out_pad), lambda i: (0, 0)),
        ],
        out_specs=pl.BlockSpec((tm1, f_out_pad), lambda i: (i, 0)),
        compiler_params=pltpu.CompilerParams(
            dimension_semantics=("parallel",)),
    )(x.astype(jnp.float32), w_p)

    # ---- Stage 2: out = tanh(adj @ support + bias), K-reduction ---------- #
    # TODO(synk): torch.spmm uses a sparse adjacency; here adj is streamed as a
    # dense bf16 matrix (no TPU-sparse equivalent in this kernel).
    if adj.dtype != adj_stream_dtype:
        adj = adj.astype(adj_stream_dtype)  # fallback; hoist via prepare_adjacency

    support_bytes = N * f_out_pad * 2
    resident = support_bytes <= _SUPPORT_RESIDENT_BYTES

    adj_itemsize = jnp.dtype(adj_stream_dtype).itemsize
    out_itemsize = jnp.dtype(x.dtype).itemsize
    vmem_need = (
        2 * tm * tk * adj_itemsize                                   # adj x2
        + (2 * support_bytes if resident else 2 * tk * f_out_pad * 2)  # support
        + tm * f_out_pad * 4                                         # f32 acc
        + 2 * tm * f_out_pad * out_itemsize                          # out x2
        + 4 * f_out_pad                                              # bias
    )
    # Headroom, but stay well under v7x's 64 MiB per-TC VMEM.
    vmem_limit = int(min(56 << 20, max(32 << 20, vmem_need * 3 // 2)))

    if resident:
        agg_kernel = _make_aggregate_resident_kernel(tk)
        support_spec = pl.BlockSpec((N, f_out_pad), lambda i, k: (0, 0))
    else:
        agg_kernel = _aggregate_streamed_kernel
        support_spec = pl.BlockSpec((tk, f_out_pad), lambda i, k: (k, 0))

    out_p = pl.pallas_call(
        agg_kernel,
        out_shape=jax.ShapeDtypeStruct((N, f_out_pad), x.dtype),
        grid=(N // tm, N // tk),
        in_specs=[
            pl.BlockSpec((tm, tk), lambda i, k: (i, k)),   # adj tile (bf16)
            support_spec,                                   # bf16 support
            pl.BlockSpec((1, f_out_pad), lambda i, k: (0, 0)),  # bias row
        ],
        out_specs=pl.BlockSpec((tm, f_out_pad), lambda i, k: (i, 0)),
        scratch_shapes=[pltpu.VMEM((tm, f_out_pad), jnp.float32)],
        compiler_params=pltpu.CompilerParams(
            dimension_semantics=("parallel", "arbitrary"),
            vmem_limit_bytes=vmem_limit),
    )(adj, support, b_p)

    return out_p if pad_cols == 0 else out_p[:, :f_out]


# ------------------------------- demo -------------------------------------- #

if __name__ == "__main__":
    # Small, deterministic example consistent with the module:
    # N nodes, in_features -> out_features GCN layer.
    N, in_features, out_features = 256, 32, 64
    tm, tk = 128, 128   # 2x2 grid at this small N; defaults are 1024 for real sizes

    key = jax.random.PRNGKey(0)
    k_adj, k_x, k_w, k_b = jax.random.split(key, 4)

    # Symmetric row-normalized dense adjacency (spmm treated as dense matmul).
    a = (jax.random.uniform(k_adj, (N, N)) < 0.05).astype(jnp.float32)
    adj = a + a.T + jnp.eye(N, dtype=jnp.float32)
    adj = adj / jnp.maximum(adj.sum(axis=1, keepdims=True), 1.0)

    x = jax.random.normal(k_x, (N, in_features), dtype=jnp.float32)

    # reset_parameters(): uniform(-stdv, stdv), stdv = 1/sqrt(out_features)
    stdv = 1.0 / math.sqrt(out_features)
    weight = jax.random.uniform(k_w, (in_features, out_features),
                                minval=-stdv, maxval=stdv, dtype=jnp.float32)
    bias = jax.random.uniform(k_b, (out_features,),
                              minval=-stdv, maxval=stdv, dtype=jnp.float32)

    # Hoisted, one-time adjacency quantization (amortized across layers/steps).
    adj_bf16 = prepare_adjacency(adj, jnp.bfloat16)

    out = graph_convolution(adj_bf16, x, weight, bias, tm=tm, tk=tk)
    out = jax.block_until_ready(out)
    assert out.shape == (N, out_features)

    # Pure-JAX references.
    support_ref = x @ weight
    ref_f32 = jnp.tanh(adj @ support_ref + bias)
    # Reference using the same bf16 adjacency + bf16 support quantization.
    adj_q = adj.astype(jnp.bfloat16).astype(jnp.float32)
    sup_q = support_ref.astype(jnp.bfloat16).astype(jnp.float32)
    ref_quant = jnp.tanh(adj_q @ sup_q + bias)

    # Tight check against the matching-quantization reference.
    assert jnp.allclose(out, ref_quant, atol=5e-3, rtol=5e-3), \
        float(jnp.max(jnp.abs(out - ref_quant)))
    # Looser check against the full-f32 reference (bf16 quantization bound).
    assert jnp.max(jnp.abs(out - ref_f32)) < 2e-2, \
        float(jnp.max(jnp.abs(out - ref_f32)))

    print("KERNEL_OK")
</pallas_src>

<mosaic_0001>
module attributes {stable_mosaic.version = 11 : i64} {
  func.func @_support_kernel(%arg0: i32, %arg1: memref<256x32xf32, #tpu.memory_space<vmem>>, %arg2: memref<32x128xf32, #tpu.memory_space<vmem>>, %arg3: memref<256x128xbf16, #tpu.memory_space<vmem>>) attributes {dimension_semantics = [#tpu.dimension_semantics<parallel>], iteration_bounds = array<i64: 1>, scalar_prefetch = 0 : i64, scratch_operands = 0 : i64, tpu.core_type = #tpu.core_type<tc>, window_params = [{transform_indices = @transform_0, window_bounds = array<i64: 256, 32>}, {pipeline_mode = #tpu.pipeline_mode<synchronous>, transform_indices = @transform_1, window_bounds = array<i64: 32, 128>}, {transform_indices = @transform_2, window_bounds = array<i64: 256, 128>}]} {
    %c0 = arith.constant 0 : index
    %c0_0 = arith.constant 0 : index
    %0 = vector.load %arg1[%c0, %c0_0] : memref<256x32xf32, #tpu.memory_space<vmem>>, vector<256x32xf32>
    %c0_1 = arith.constant 0 : index
    %c0_2 = arith.constant 0 : index
    %1 = vector.load %arg2[%c0_1, %c0_2] : memref<32x128xf32, #tpu.memory_space<vmem>>, vector<32x128xf32>
    %cst = arith.constant dense<0.000000e+00> : vector<256x128xf32>
    %2 = tpu.matmul %0, %1, %cst {dimension_numbers = #tpu.dot_dimension_numbers<[1], [0], [0], [1], [0, 0, 1, 1], [], []>} : vector<256x32xf32>, vector<32x128xf32>, vector<256x128xf32> -> vector<256x128xf32>
    %3 = arith.truncf %2 : vector<256x128xf32> to vector<256x128xbf16>
    %c0_3 = arith.constant 0 : index
    %c0_4 = arith.constant 0 : index
    %4 = vector.load %arg3[%c0_3, %c0_4] : memref<256x128xbf16, #tpu.memory_space<vmem>>, vector<256x128xbf16>
    tpu.vector_store %arg3[%c0_3, %c0_4], %3 {strides = array<i32>} : memref<256x128xbf16, #tpu.memory_space<vmem>>, vector<256x128xbf16>,
    return
  }
  func.func @transform_0(%arg0: i32) -> (i32, i32) {
    %c0_i32 = arith.constant 0 : i32
    %c0_i32_0 = arith.constant 0 : i32
    return %arg0, %c0_i32 : i32, i32
  }
  func.func @transform_1(%arg0: i32) -> (i32, i32) {
    %c0_i32 = arith.constant 0 : i32
    %c0_i32_0 = arith.constant 0 : i32
    %c0_i32_1 = arith.constant 0 : i32
    return %c0_i32, %c0_i32_0 : i32, i32
  }
  func.func @transform_2(%arg0: i32) -> (i32, i32) {
    %c0_i32 = arith.constant 0 : i32
    %c0_i32_0 = arith.constant 0 : i32
    return %arg0, %c0_i32 : i32, i32
  }
}

</mosaic_0001>

<bundles_post_ra>
// kernel: tpu_custom_call.1
= control target key start
LH: loop header
LB: loop body
LE: loop exit
PB: predicated region body
PF: predicated region fallthrough
CT: control target
= control target key end

     0   :  { %vm48_vm0 = vcmask 261120   ;;  %s1038_s0 = inlined_call_operand.vmem [shape: f32[256,32], index: 0, kind: input, shape index: {}]   ;;  %s1039_s1 = inlined_call_operand.vmem [shape: f32[32,128], index: 1, kind: input, shape index: {}]   ;;  %s1040_s2 = inlined_call_operand.hbm [shape: bf16[256,128], index: 2, kind: output, shape index: {}]  }
   0x1   :  { %v44_v0 = vld [vmem:[%s1039_s1] sm:$0xff]  ;;  %v45_v1 = vld [vmem:[%s1039_s1 + $0x8] sm:$0xff]  ;;  %v46_v2 = vld [vmem:[%s1039_s1 + $0x10] sm:$0xff] }
   0x2   :  { %v829_v3 = vpack.c.bf16 %v45_v1, %v44_v0  ;;  %v47_v4 = vld [vmem:[%s1039_s1 + $0x18] sm:$0xff]  ;;  %v12_v5 = vld [vmem:[%s1038_s0] sm:$0xff]  ;;  %v13_v8 = vld [vmem:[%s1038_s0 + $0x8] sm:$0xff] }
   0x3   :  { %v28_v6 = vld [vmem:[%s1038_s0 + $0x80] sm:$0xff]  ;;  %v833_v7 = vpack.c.bf16 %v47_v4, %v46_v2  ;;  %781 = vmatprep.mubr.msk.f32.mxu0 %vm48_vm0, %v12_v5  ;;  %v29_v9 = vld [vmem:[%s1038_s0 + $0x88] sm:$0xff]  ;;  %v14_v10 = vld [vmem:[%s1038_s0 + $0x10] sm:$0xff] }
   0x4   :  { %805 = vmatprep.mubr.msk.f32.mxu1 %vm48_vm0, %v28_v6  ;;  %830 = vmatprep.subr.bf16.mxu0 %v829_v3  ;;  %v30_v11 = vld [vmem:[%s1038_s0 + $0x90] sm:$0xff]  ;;  %v15_v12 = vld [vmem:[%s1038_s0 + $0x18] sm:$0xff] }
   0x5   :  { %837 = vmatprep.subr.bf16.mxu1 %v829_v3  ;;  %832 = vmatpush3.bf16.msra.mxu0 %v829_v3  ;;  %v31_v13 = vld [vmem:[%s1038_s0 + $0x98] sm:$0xff] }
   0x6   :  { %839 = vmatpush3.bf16.msra.mxu1 %v829_v3  ;;  %834 = vmatprep.subr.bf16.mxu0 %v833_v7 }
   0x7   :  { %838 = vmatprep.subr.bf16.mxu1 %v833_v7 }
   0x9   :  { %836 = vmatpush3.bf16.msra.mxu0 %v833_v7 }
   0xa   :  { %840 = vmatpush3.bf16.msra.mxu1 %v833_v7 }
   0xc   :  { %782 = vmatmul.mubr.msk.f32.vlgmr.msra.gmra.mrb[0].mxu0 %vm48_vm0, %v13_v8 }
   0xd   :  { %806 = vmatmul.mubr.msk.f32.vlgmr.msra.gmra.mrb[0].mxu1 %vm48_vm0, %v29_v9  ;;  %784 = vmatprep.mubr.msk.f32.mxu0 %vm48_vm0, %v14_v10 }
   0xe   :  { %808 = vmatprep.mubr.msk.f32.mxu1 %vm48_vm0, %v30_v11 }
   0xf   :  { %7 = vsyncpa [#allocation3], 0  ;;  %v16_v14 = vld [vmem:[%s1038_s0 + $0x20] sm:$0xff]  ;;  %v17_v16 = vld [vmem:[%s1038_s0 + $0x28] sm:$0xff] }
  0x10   :  { %v32_v15 = vld [vmem:[%s1038_s0 + $0xa0] sm:$0xff]  ;;  %785 = vmatmul.mubr.msk.f32.gmra.mrb[2].mxu0 %vm48_vm0, %v15_v12  ;;  %v33_v17 = vld [vmem:[%s1038_s0 + $0xa8] sm:$0xff]  ;;  %v18_v18 = vld [vmem:[%s1038_s0 + $0x30] sm:$0xff] }
  0x11   :  { %809 = vmatmul.mubr.msk.f32.gmra.mrb[2].mxu1 %vm48_vm0, %v31_v13  ;;  %787 = vmatprep.mubr.msk.f32.mxu0 %vm48_vm0, %v16_v14  ;;  %v34_v19 = vld [vmem:[%s1038_s0 + $0xb0] sm:$0xff]  ;;  %v19_v20 = vld [vmem:[%s1038_s0 + $0x38] sm:$0xff]  ;;  %v20_v22 = vld [vmem:[%s1038_s0 + $0x40] sm:$0xff] }
  0x12   :  { %811 = vmatprep.mubr.msk.f32.mxu1 %vm48_vm0, %v32_v15  ;;  %v35_v21 = vld [vmem:[%s1038_s0 + $0xb8] sm:$0xff]  ;;  %v36_v23 = vld [vmem:[%s1038_s0 + $0xc0] sm:$0xff]  ;;  %v21_v24 = vld [vmem:[%s1038_s0 + $0x48] sm:$0xff] }
  0x13   :  { %v37_v25 = vld [vmem:[%s1038_s0 + $0xc8] sm:$0xff]  ;;  %v22_v26 = vld [vmem:[%s1038_s0 + $0x50] sm:$0xff]  ;;  %v23_v28 = vld [vmem:[%s1038_s0 + $0x58] sm:$0xff] }
  0x14   :  { %788 = vmatmul.mubr.msk.f32.gmra.mrb[4].mxu0 %vm48_vm0, %v17_v16  ;;  %v38_v27 = vld [vmem:[%s1038_s0 + $0xd0] sm:$0xff]  ;;  %v39_v29 = vld [vmem:[%s1038_s0 + $0xd8] sm:$0xff]  ;;  %v24_v30 = vld [vmem:[%s1038_s0 + $0x60] sm:$0xff] }
  0x15   :  { %812 = vmatmul.mubr.msk.f32.gmra.mrb[4].mxu1 %vm48_vm0, %v33_v17  ;;  %790 = vmatprep.mubr.msk.f32.mxu0 %vm48_vm0, %v18_v18  ;;  %v40_v31 = vld [vmem:[%s1038_s0 + $0xe0] sm:$0xff]  ;;  %v25_v32 = vld [vmem:[%s1038_s0 + $0x68] sm:$0xff]  ;;  %v26_v34 = vld [vmem:[%s1038_s0 + $0x70] sm:$0xff] }
  0x16   :  { %814 = vmatprep.mubr.msk.f32.mxu1 %vm48_vm0, %v34_v19  ;;  %v41_v33 = vld [vmem:[%s1038_s0 + $0xe8] sm:$0xff]  ;;  %v42_v35 = vld [vmem:[%s1038_s0 + $0xf0] sm:$0xff]  ;;  %v27_v36 = vld [vmem:[%s1038_s0 + $0x78] sm:$0xff] }
  0x17   :  { %v43_v37 = vld [vmem:[%s1038_s0 + $0xf8] sm:$0xff]  ;;  %s868_s0 = smov [#allocation2]  }
  0x18   :  { %791 = vmatmul.mubr.msk.f32.gmra.mrb[6].mxu0 %vm48_vm0, %v19_v20  ;;  %s535_s22 = sshll.u32 %s868_s0, 4  ;;  %s536_s22 = int_to_ptr.vmem [resolvable:$true] %s535_s22 }
  0x19   :  { %815 = vmatmul.mubr.msk.f32.gmra.mrb[6].mxu1 %vm48_vm0, %v35_v21  ;;  %793 = vmatprep.mubr.msk.f32.mxu0 %vm48_vm0, %v20_v22  ;;  %s844_s23 = scalar_lea.vmem %s536_s22, 2048  ;;  %p849_p1 = scmp.lt.s32.totalorder %s536_s22, %s536_s22 }
  0x1a   :  { %817 = vmatprep.mubr.msk.f32.mxu1 %vm48_vm0, %v36_v23  ;;  %p845_p0 = scmp.ne.s32.totalorder %s536_s22, %s844_s23  ;;  %p850_p2 = scmp.lt.s32.totalorder %s844_s23, %s844_s23 }
  0x1c   :  { %794 = vmatmul.mubr.msk.f32.gmra.mrb[8].mxu0 %vm48_vm0, %v21_v24  ;;  %p851_p3 = por %p850_p2, %p849_p1 }
  0x1d   :  { %818 = vmatmul.mubr.msk.f32.gmra.mrb[8].mxu1 %vm48_vm0, %v37_v25  ;;  %796 = vmatprep.mubr.msk.f32.mxu0 %vm48_vm0, %v22_v26 }
  0x1e   :  { %820 = vmatprep.mubr.msk.f32.mxu1 %vm48_vm0, %v38_v27  ;;  %p852_p4 = pnand %p851_p3, %p845_p0 }
  0x20   :  { %797 = vmatmul.mubr.msk.f32.gmra.mrb[10].mxu0 %vm48_vm0, %v23_v28 }
  0x21   :  { %821 = vmatmul.mubr.msk.f32.gmra.mrb[10].mxu1 %vm48_vm0, %v39_v29  ;;  %799 = vmatprep.mubr.msk.f32.mxu0 %vm48_vm0, %v24_v30 }
  0x22   :  { %823 = vmatprep.mubr.msk.f32.mxu1 %vm48_vm0, %v40_v31 }
  0x24   :  { %800 = vmatmul.mubr.msk.f32.gmra.mrb[12].mxu0 %vm48_vm0, %v25_v32 }
  0x25   :  { %824 = vmatmul.mubr.msk.f32.gmra.mrb[12].mxu1 %vm48_vm0, %v41_v33  ;;  %802 = vmatprep.mubr.msk.f32.mxu0 %vm48_vm0, %v26_v34 }
  0x26   :  { %826 = vmatprep.mubr.msk.f32.mxu1 %vm48_vm0, %v42_v35 }
  0x28   :  { %803 = vmatmul.mubr.msk.f32.gmra.mrb[14].mxu0 %vm48_vm0, %v27_v36 }
  0x29   :  { %827 = vmatmul.mubr.msk.f32.gmra.mrb[14].mxu1 %vm48_vm0, %v43_v37 }
  0xdf   :  { %v783_v38 = vpop.f32.mrb[0].mxu0 }
  0xe0   :  { %v807_v39 = vpop.f32.mrb[0].mxu1  ;;  %v211_v40 = vpop.f32.mrb[1].mxu0 }
  0xe1   :  { %v291_v41 = vpop.f32.mrb[1].mxu1  ;;  %v645_v42 = vpack.c.bf16 %v783_v38, %v211_v40 }
  0xe2   :  { %v685_v43 = vpack.c.bf16 %v807_v39, %v291_v41 }
  0xe3   :  { %646 = vst [vmem:[#allocation2] sm:$0xff] %v645_v42   ;;  %v786_v44 = vpop.f32.mrb[2].mxu0 }
  0xe4   :  { %729 = vst [vmem:[#allocation2 + $0x40] sm:$0xff] %v685_v43   ;;  %v810_v45 = vpop.f32.mrb[2].mxu1  ;;  %v221_v46 = vpop.f32.mrb[3].mxu0 }
  0xe5   :  { %v301_v47 = vpop.f32.mrb[3].mxu1  ;;  %v650_v48 = vpack.c.bf16 %v786_v44, %v221_v46 }
  0xe6   :  { %v690_v49 = vpack.c.bf16 %v810_v45, %v301_v47 }
  0xe7   :  { %722 = vst [vmem:[#allocation2 + $0x8] sm:$0xff] %v650_v48   ;;  %v789_v50 = vpop.f32.mrb[4].mxu0 }
  0xe8   :  { %730 = vst [vmem:[#allocation2 + $0x48] sm:$0xff] %v690_v49   ;;  %v813_v51 = vpop.f32.mrb[4].mxu1  ;;  %v231_v52 = vpop.f32.mrb[5].mxu0 }
  0xe9   :  { %v311_v53 = vpop.f32.mrb[5].mxu1  ;;  %v655_v54 = vpack.c.bf16 %v789_v50, %v231_v52 }
  0xea   :  { %v695_v55 = vpack.c.bf16 %v813_v51, %v311_v53 }
  0xeb   :  { %723 = vst [vmem:[#allocation2 + $0x10] sm:$0xff] %v655_v54   ;;  %v792_v56 = vpop.f32.mrb[6].mxu0 }
  0xec   :  { %731 = vst [vmem:[#allocation2 + $0x50] sm:$0xff] %v695_v55   ;;  %v816_v57 = vpop.f32.mrb[6].mxu1  ;;  %v241_v58 = vpop.f32.mrb[7].mxu0 }
  0xed   :  { %v321_v59 = vpop.f32.mrb[7].mxu1  ;;  %v660_v60 = vpack.c.bf16 %v792_v56, %v241_v58 }
  0xee   :  { %v700_v61 = vpack.c.bf16 %v816_v57, %v321_v59 }
  0xef   :  { %724 = vst [vmem:[#allocation2 + $0x18] sm:$0xff] %v660_v60   ;;  %v795_v62 = vpop.f32.mrb[8].mxu0 }
  0xf0   :  { %732 = vst [vmem:[#allocation2 + $0x58] sm:$0xff] %v700_v61   ;;  %v819_v63 = vpop.f32.mrb[8].mxu1  ;;  %v251_v0 = vpop.f32.mrb[9].mxu0 }
  0xf1   :  { %v331_v1 = vpop.f32.mrb[9].mxu1  ;;  %v665_v2 = vpack.c.bf16 %v795_v62, %v251_v0 }
  0xf2   :  { %v705_v3 = vpack.c.bf16 %v819_v63, %v331_v1 }
  0xf3   :  { %725 = vst [vmem:[#allocation2 + $0x20] sm:$0xff] %v665_v2   ;;  %v798_v4 = vpop.f32.mrb[10].mxu0 }
  0xf4   :  { %733 = vst [vmem:[#allocation2 + $0x60] sm:$0xff] %v705_v3   ;;  %v822_v5 = vpop.f32.mrb[10].mxu1  ;;  %v261_v6 = vpop.f32.mrb[11].mxu0 }
  0xf5   :  { %v341_v7 = vpop.f32.mrb[11].mxu1  ;;  %v670_v8 = vpack.c.bf16 %v798_v4, %v261_v6 }
  0xf6   :  { %v710_v9 = vpack.c.bf16 %v822_v5, %v341_v7 }
  0xf7   :  { %726 = vst [vmem:[#allocation2 + $0x28] sm:$0xff] %v670_v8   ;;  %v801_v10 = vpop.f32.mrb[12].mxu0 }
  0xf8   :  { %734 = vst [vmem:[#allocation2 + $0x68] sm:$0xff] %v710_v9   ;;  %v825_v11 = vpop.f32.mrb[12].mxu1  ;;  %v271_v12 = vpop.f32.mrb[13].mxu0 }
  0xf9   :  { %v351_v13 = vpop.f32.mrb[13].mxu1  ;;  %v675_v14 = vpack.c.bf16 %v801_v10, %v271_v12 }
  0xfa   :  { %v715_v15 = vpack.c.bf16 %v825_v11, %v351_v13 }
  0xfb   :  { %727 = vst [vmem:[#allocation2 + $0x30] sm:$0xff] %v675_v14   ;;  %v804_v16 = vpop.f32.mrb[14].mxu0 }
  0xfc   :  { %735 = vst [vmem:[#allocation2 + $0x70] sm:$0xff] %v715_v15   ;;  %v828_v17 = vpop.f32.mrb[14].mxu1  ;;  %v281_v18 = vpop.f32.mrb[15].mxu0 }
  0xfd   :  { %v361_v19 = vpop.f32.mrb[15].mxu1  ;;  %v680_v20 = vpack.c.bf16 %v804_v16, %v281_v18 }
  0xfe   :  { %v720_v21 = vpack.c.bf16 %v828_v17, %v361_v19 }
  0xff   :  { %728 = vst [vmem:[#allocation2 + $0x38] sm:$0xff] %v680_v20  }
 0x100   :  { %736 = vst [vmem:[#allocation2 + $0x78] sm:$0xff] %v720_v21  }
 0x101   :  { %855 = shalt.err (!%p852_p4)
}
 0x102   :  { %s856_s26 = scalar_lea.hbm %s1040_s2, 2048 }
 0x103   :  { %p857_p5 = scmp.ne.s32.totalorder %s1040_s2, %s856_s26  ;;  %p860_p6 = scmp.lt.u32.totalorder %s856_s26, %s1040_s2 }
 0x105   :  { %p862_p7 = pnand %p860_p6, %p857_p5 }
 0x107   :  { %865 = shalt.err (!%p862_p7)
}
 0x108   :  { %s869_s3 = smov 64   ;;  %s870_s4 = smov 4  }
 0x109   :  { %541 = dma.vmem_to_hbm [thread:$0]  %s536_s22, 2048, %s1040_s2, [#allocation3], %s869_s3, %s869_s3, %s870_s4  }
 0x10a   :  { %866 = dma.done.wait [#allocation3], 2048  }
 0x10b   :  { %867 = vsyncadd [#allocation3], 4294965248 }
 0x10c   :  { %545 = vsyncpa [#allocation3], 1 }

</bundles_post_ra>
